<compile_context>
chip_gen: v6e
topology: v6e:2x2x1
jax: 0.10.0
libtpu: 0.0.40
codegen_flags: <defaults>
</compile_context>

<pallas_src>
import math
import functools

import numpy as np
import jax
import jax.numpy as jnp
from jax.experimental import pallas as pl
from jax.experimental.pallas import tpu as pltpu


# --------------------------------------------------------------------------
# Helpers
# --------------------------------------------------------------------------

def _round_up(x, m):
    return ((x + m - 1) // m) * m


def _pad2(x, rows, cols):
    r, c = x.shape
    if r == rows and c == cols:
        return x
    return jnp.pad(x, ((0, rows - r), (0, cols - c)))


# Tile caps (sized so double-buffered input tiles + f32 accumulator stay well
# inside the 32 MiB default scoped VMEM -> safe on v5e/v6e/v7x alike).
_TM, _TN, _TK = 256, 512, 512


def _tile_m(M):
    if M <= _TM:
        tm = _round_up(M, 8)
        return tm, tm
    return _TM, _round_up(M, _TM)


def _tile_n(N):
    if N <= _TN:
        return N, N
    return _TN, _round_up(N, _TN)


def _tile_k(K):
    if K <= _TK:
        return K, K
    return _TK, _round_up(K, _TK)


# --------------------------------------------------------------------------
# Pallas kernels
# --------------------------------------------------------------------------

def _matmul_kernel(x_ref, w_ref, b_ref, o_ref, acc_ref, *, activation):
    """Tiled matmul with f32 accumulator; fused bias (+GELU) epilogue."""
    k = pl.program_id(2)

    @pl.when(k == 0)
    def _():
        acc_ref[...] = jnp.zeros_like(acc_ref)

    acc_ref[...] += jnp.dot(x_ref[...], w_ref[...],
                            preferred_element_type=jnp.float32)

    @pl.when(k == pl.num_programs(2) - 1)
    def _():
        y = acc_ref[...] + b_ref[...]
        if activation == "gelu":
            y = jax.nn.gelu(y, approximate=True)
        o_ref[...] = y.astype(o_ref.dtype)


def dense(x, w, b, activation=None, out_dtype=jnp.bfloat16):
    """y = act(x @ w + b); bf16 operands, f32 accumulation, tiled over M/N/K."""
    shp = x.shape
    K = shp[-1]
    M = int(np.prod(shp[:-1]))
    N = w.shape[1]
    tm, Mp = _tile_m(M)
    tn, Np = _tile_n(N)
    tk, Kp = _tile_k(K)

    x2 = _pad2(x.reshape(M, K).astype(jnp.bfloat16), Mp, Kp)
    w2 = _pad2(w.astype(jnp.bfloat16), Kp, Np)
    b2 = _pad2(b.reshape(1, N).astype(jnp.float32), 1, Np)

    out = pl.pallas_call(
        functools.partial(_matmul_kernel, activation=activation),
        out_shape=jax.ShapeDtypeStruct((Mp, Np), out_dtype),
        grid=(Mp // tm, Np // tn, Kp // tk),
        in_specs=[
            pl.BlockSpec((tm, tk), lambda i, j, k: (i, k)),
            pl.BlockSpec((tk, tn), lambda i, j, k: (k, j)),
            pl.BlockSpec((1, tn), lambda i, j, k: (0, j)),
        ],
        out_specs=pl.BlockSpec((tm, tn), lambda i, j, k: (i, j)),
        scratch_shapes=[pltpu.VMEM((tm, tn), jnp.float32)],
        compiler_params=pltpu.CompilerParams(
            dimension_semantics=("parallel", "parallel", "arbitrary")),
    )(x2, w2, b2)
    out = out[:M, :N]
    return out.reshape(shp[:-1] + (N,))


def _matmul_res_ln_kernel(*refs, activation, has_res, eps):
    """Tiled matmul (full N resident) + fused bias(+GELU)(+residual)+LayerNorm."""
    if has_res:
        x_ref, w_ref, b_ref, r_ref, g_ref, bb_ref, o_ref, acc_ref = refs
    else:
        x_ref, w_ref, b_ref, g_ref, bb_ref, o_ref, acc_ref = refs
        r_ref = None
    k = pl.program_id(1)

    @pl.when(k == 0)
    def _():
        acc_ref[...] = jnp.zeros_like(acc_ref)

    acc_ref[...] += jnp.dot(x_ref[...], w_ref[...],
                            preferred_element_type=jnp.float32)

    @pl.when(k == pl.num_programs(1) - 1)
    def _():
        y = acc_ref[...] + b_ref[...]
        if activation == "gelu":
            y = jax.nn.gelu(y, approximate=True)
        if has_res:
            y = y + r_ref[...].astype(jnp.float32)
        mean = jnp.mean(y, axis=-1, keepdims=True)
        var = jnp.mean(jnp.square(y - mean), axis=-1, keepdims=True)
        y = (y - mean) * jax.lax.rsqrt(var + eps)
        o_ref[...] = (y * g_ref[...] + bb_ref[...]).astype(o_ref.dtype)


def dense_res_ln(x, w, b, gamma, beta, residual=None, activation=None,
                 eps=1e-12, out_dtype=jnp.bfloat16):
    """LayerNorm(act(x @ w + b) [+ residual]); fused epilogue, tiled over M/K."""
    shp = x.shape
    K = shp[-1]
    M = int(np.prod(shp[:-1]))
    N = w.shape[1]
    tm, Mp = _tile_m(M)
    tk, Kp = _tile_k(K)

    x2 = _pad2(x.reshape(M, K).astype(jnp.bfloat16), Mp, Kp)
    w2 = _pad2(w.astype(jnp.bfloat16), Kp, N)
    b2 = b.reshape(1, N).astype(jnp.float32)

    inputs = [x2, w2, b2]
    in_specs = [
        pl.BlockSpec((tm, tk), lambda i, k: (i, k)),
        pl.BlockSpec((tk, N), lambda i, k: (k, 0)),
        pl.BlockSpec((1, N), lambda i, k: (0, 0)),
    ]
    has_res = residual is not None
    if has_res:
        r2 = _pad2(residual.reshape(M, N).astype(jnp.bfloat16), Mp, N)
        inputs.append(r2)
        in_specs.append(pl.BlockSpec((tm, N), lambda i, k: (i, 0)))
    inputs += [gamma.reshape(1, N).astype(jnp.float32),
               beta.reshape(1, N).astype(jnp.float32)]
    in_specs += [pl.BlockSpec((1, N), lambda i, k: (0, 0)),
                 pl.BlockSpec((1, N), lambda i, k: (0, 0))]

    out = pl.pallas_call(
        functools.partial(_matmul_res_ln_kernel, activation=activation,
                          has_res=has_res, eps=eps),
        out_shape=jax.ShapeDtypeStruct((Mp, N), out_dtype),
        grid=(Mp // tm, Kp // tk),
        in_specs=in_specs,
        out_specs=pl.BlockSpec((tm, N), lambda i, k: (i, 0)),
        scratch_shapes=[pltpu.VMEM((tm, N), jnp.float32)],
        compiler_params=pltpu.CompilerParams(
            dimension_semantics=("parallel", "arbitrary")),
    )(*inputs)
    return out[:M].reshape(shp[:-1] + (N,))


def _ln_kernel(x_ref, g_ref, b_ref, o_ref, *, eps):
    x = x_ref[...].astype(jnp.float32)
    mean = jnp.mean(x, axis=-1, keepdims=True)
    var = jnp.mean(jnp.square(x - mean), axis=-1, keepdims=True)
    y = (x - mean) * jax.lax.rsqrt(var + eps)
    o_ref[...] = (y * g_ref[...] + b_ref[...]).astype(o_ref.dtype)


def layer_norm(x, gamma, beta, eps=1e-12, out_dtype=jnp.bfloat16):
    """Standalone LayerNorm (embedding LN only); other LNs are fused into matmuls."""
    shp = x.shape
    H = shp[-1]
    M = int(np.prod(shp[:-1]))
    tm, Mp = _tile_m(M)
    x2 = _pad2(x.reshape(M, H).astype(jnp.float32), Mp, H)
    out = pl.pallas_call(
        functools.partial(_ln_kernel, eps=eps),
        out_shape=jax.ShapeDtypeStruct((Mp, H), out_dtype),
        grid=(Mp // tm,),
        in_specs=[
            pl.BlockSpec((tm, H), lambda i: (i, 0)),
            pl.BlockSpec((1, H), lambda i: (0, 0)),
            pl.BlockSpec((1, H), lambda i: (0, 0)),
        ],
        out_specs=pl.BlockSpec((tm, H), lambda i: (i, 0)),
        compiler_params=pltpu.CompilerParams(
            dimension_semantics=("parallel",)),
    )(x2, gamma.reshape(1, H).astype(jnp.float32),
      beta.reshape(1, H).astype(jnp.float32))
    return out[:M].reshape(shp)


def mha(q, k, v, bias, out_dtype=jnp.bfloat16):
    """Scaled-dot-product attention with additive bias broadcast across heads.

    q: [B, NH, Sq, Dh]; k, v: [B, NH, Sk, Dh]; bias: [B, 1, {1|Sq}, Sk].
    Grid over batch; all heads processed in one step (batched MXU matmuls);
    bias is broadcast across heads in-kernel (never materialized NH times in HBM).
    """
    B, NH, Sq, Dh = q.shape
    Sk = k.shape[2]
    bq = bias.shape[2]
    scale = 1.0 / math.sqrt(Dh)

    def kernel(q_ref, k_ref, v_ref, b_ref, o_ref):
        qh = q_ref[0]                 # (NH, Sq, Dh) bf16
        kh = k_ref[0]
        vh = v_ref[0]
        s = jnp.einsum("hqd,hkd->hqk", qh, kh,
                       preferred_element_type=jnp.float32) * scale
        s = s + b_ref[0]              # (1, bq, Sk) broadcast over heads / rows
        m = jnp.max(s, axis=-1, keepdims=True)
        p = jnp.exp(s - m)
        l = jnp.sum(p, axis=-1, keepdims=True)
        p = p * pl.reciprocal(l, approx=True)
        o = jnp.einsum("hqk,hkd->hqd", p.astype(vh.dtype), vh,
                       preferred_element_type=jnp.float32)
        o_ref[0] = o.astype(o_ref.dtype)

    return pl.pallas_call(
        kernel,
        out_shape=jax.ShapeDtypeStruct((B, NH, Sq, Dh), out_dtype),
        grid=(B,),
        in_specs=[
            pl.BlockSpec((1, NH, Sq, Dh), lambda b: (b, 0, 0, 0)),
            pl.BlockSpec((1, NH, Sk, Dh), lambda b: (b, 0, 0, 0)),
            pl.BlockSpec((1, NH, Sk, Dh), lambda b: (b, 0, 0, 0)),
            pl.BlockSpec((1, 1, bq, Sk), lambda b: (b, 0, 0, 0)),
        ],
        out_specs=pl.BlockSpec((1, NH, Sq, Dh), lambda b: (b, 0, 0, 0)),
        compiler_params=pltpu.CompilerParams(
            dimension_semantics=("parallel",)),
    )(q.astype(jnp.bfloat16), k.astype(jnp.bfloat16),
      v.astype(jnp.bfloat16), bias.astype(jnp.float32))


# --------------------------------------------------------------------------
# Parameters (deterministic init)
# --------------------------------------------------------------------------

def _normal(key, shape):
    return jax.random.normal(key, shape, jnp.float32) * 0.02


def init_params(key, cfg):
    H, V, F = cfg["hidden"], cfg["vocab"], cfg["ffn"]
    keys = iter(jax.random.split(key, 512))
    nk = lambda: next(keys)

    def attn_block():
        return dict(wq=_normal(nk(), (H, H)), bq=jnp.zeros(H, jnp.float32),
                    wk=_normal(nk(), (H, H)), bk=jnp.zeros(H, jnp.float32),
                    wv=_normal(nk(), (H, H)), bv=jnp.zeros(H, jnp.float32),
                    wo=_normal(nk(), (H, H)), bo=jnp.zeros(H, jnp.float32),
                    ln_g=jnp.ones(H, jnp.float32), ln_b=jnp.zeros(H, jnp.float32))

    def ffn_block_p():
        return dict(w1=_normal(nk(), (H, F)), b1=jnp.zeros(F, jnp.float32),
                    w2=_normal(nk(), (F, H)), b2=jnp.zeros(H, jnp.float32),
                    ln_g=jnp.ones(H, jnp.float32), ln_b=jnp.zeros(H, jnp.float32))

    def emb_block():
        return dict(word=_normal(nk(), (V, H)),
                    pos=_normal(nk(), (cfg["max_pos"], H)),
                    typ=_normal(nk(), (2, H)),
                    ln_g=jnp.ones(H, jnp.float32), ln_b=jnp.zeros(H, jnp.float32))

    enc_layers = [dict(attn=attn_block(), ffn=ffn_block_p())
                  for _ in range(cfg["enc_layers"])]
    dec_layers = [dict(attn=attn_block(), cross=attn_block(), ffn=ffn_block_p())
                  for _ in range(cfg["dec_layers"])]
    # LM head: decoder vocab projection weight is TIED to the decoder word
    # embedding (matches HF BertLMHeadModel); only the bias is independent.
    lm_head = dict(tw=_normal(nk(), (H, H)), tb=jnp.zeros(H, jnp.float32),
                   ln_g=jnp.ones(H, jnp.float32), ln_b=jnp.zeros(H, jnp.float32),
                   db=jnp.zeros(V, jnp.float32))
    return dict(enc_emb=emb_block(), enc_layers=enc_layers,
                dec_emb=emb_block(), dec_layers=dec_layers, lm_head=lm_head)


# --------------------------------------------------------------------------
# Model forward (glue around Pallas kernels)
# --------------------------------------------------------------------------

def split_heads(x, nh):
    B, S, H = x.shape
    return x.reshape(B, S, nh, H // nh).transpose(0, 2, 1, 3)


def merge_heads(x):
    B, NH, S, DH = x.shape
    return x.transpose(0, 2, 1, 3).reshape(B, S, NH * DH)


def attention_block(h, kv, p, bias, nh):
    q = split_heads(dense(h, p["wq"], p["bq"]), nh)
    k = split_heads(dense(kv, p["wk"], p["bk"]), nh)
    v = split_heads(dense(kv, p["wv"], p["bv"]), nh)
    ctx = merge_heads(mha(q, k, v, bias))
    # output projection + bias + residual + LayerNorm fused in one kernel
    return dense_res_ln(ctx, p["wo"], p["bo"], p["ln_g"], p["ln_b"], residual=h)


def ffn_block(h, p):
    y = dense(h, p["w1"], p["b1"], activation="gelu")
    # w2 + bias + residual + LayerNorm fused in one kernel
    return dense_res_ln(y, p["w2"], p["b2"], p["ln_g"], p["ln_b"], residual=h)


def embed(tok, type_ids, p):
    B, S = tok.shape
    x = p["word"][tok] + p["pos"][jnp.arange(S)][None, :, :] + p["typ"][type_ids]
    return layer_norm(x, p["ln_g"], p["ln_b"])


def get_initial_A(ip_text_mask, ip_event_loc):
    """A = scatter(mask, event_loc -> 0)[:, :-1]; super-diag + its transpose."""
    A = ip_text_mask.astype(jnp.float32)
    B = A.shape[0]
    A = A.at[jnp.arange(B)[:, None], ip_event_loc].set(0.0)
    A = A[:, :-1]                                   # [B, S-1]
    S = A.shape[1] + 1
    idx = jnp.arange(S - 1)
    A_init = jnp.zeros((B, S, S), jnp.float32)
    A_init = A_init.at[:, idx, idx + 1].set(A)      # k=+1 diagonal
    A_init = A_init + jnp.swapaxes(A_init, -1, -2)  # symmetrize
    return A_init


def encoder_forward(params, cfg, tok, seg, attention_mask, A_prior):
    NH = cfg["heads"]
    h = embed(tok, seg, params["enc_emb"])
    # bias shape [B, 1, S, S]: padding mask + tree prior, broadcast over heads
    # inside the attention kernel (never materialized NH times).
    mask_bias = (1.0 - attention_mask.astype(jnp.float32))[:, None, None, :] * -1e9
    bias = mask_bias + A_prior[:, None, :, :]
    for layer in params["enc_layers"]:
        h = attention_block(h, h, layer["attn"], bias, NH)
        h = ffn_block(h, layer["ffn"])
    return h


def decoder_forward(params, cfg, tok, pad_mask, enc_h, enc_mask, labels):
    NH = cfg["heads"]
    h = embed(tok, jnp.zeros_like(tok), params["dec_emb"])
    B, St, _ = h.shape
    E = enc_h.shape[1]
    causal = jnp.tril(jnp.ones((St, St), jnp.float32))
    self_bias = (1.0 - causal)[None, None, :, :] * -1e9 \
        + (1.0 - pad_mask.astype(jnp.float32))[:, None, None, :] * -1e9   # [B,1,St,St]
    cross_bias = (1.0 - enc_mask.astype(jnp.float32))[:, None, None, :] * -1e9  # [B,1,1,E]
    for layer in params["dec_layers"]:
        h = attention_block(h, h, layer["attn"], self_bias, NH)
        h = attention_block(h, enc_h, layer["cross"], cross_bias, NH)
        h = ffn_block(h, layer["ffn"])

    # BERT LM prediction head: transform + GELU + LN fused, then tied vocab proj.
    lm = params["lm_head"]
    t = dense_res_ln(h, lm["tw"], lm["tb"], lm["ln_g"], lm["ln_b"],
                     activation="gelu")
    tied_w = params["dec_emb"]["word"].T                       # (H, V), tied
    logits = dense(t, tied_w, lm["db"], out_dtype=jnp.float32)

    # Causal LM loss with the HF BertLMHeadModel shift and ignore_index=-100.
    pred = logits[:, :-1, :]
    lab = labels[:, 1:]
    valid = (lab != -100)
    lab_safe = jnp.where(valid, lab, 0)
    logp = jax.nn.log_softmax(pred, axis=-1)
    nll = -jnp.take_along_axis(logp, lab_safe[..., None], axis=-1)[..., 0]
    denom = jnp.maximum(jnp.sum(valid.astype(jnp.float32)), 1.0)
    loss = jnp.sum(nll * valid.astype(jnp.float32)) / denom
    return {"loss": loss, "logits": logits}


def tree_bert2bert_forward(params, cfg, src_text_tok, src_text_mask, src_event_loc,
                           src_event_pad_mask, tar_text_tok, tar_pad_mask,
                           et_sep=True):
    # decoder labels: pad token (0) -> -100
    decoder_label = jnp.where(tar_text_tok == 0, -100, tar_text_tok)

    A_initial = get_initial_A(src_text_mask, src_event_loc)
    encoded_src = encoder_forward(params, cfg, src_text_tok,
                                  jnp.ones_like(src_text_tok),
                                  src_text_mask, A_initial)
    enc_mask = src_text_mask
    if et_sep:
        B = encoded_src.shape[0]
        encoded_src = encoded_src[jnp.arange(B)[:, None], src_event_loc]  # [B, E, H]
        enc_mask = src_event_pad_mask
    return decoder_forward(params, cfg, tar_text_tok, tar_pad_mask,
                           encoded_src, enc_mask, decoder_label)


# --------------------------------------------------------------------------
# Main
# --------------------------------------------------------------------------

if __name__ == "__main__":
    cfg = dict(vocab=64, hidden=32, heads=4, ffn=64, max_pos=64,
               enc_layers=1, dec_layers=1)
    B, S_src, E, S_tar = 2, 16, 4, 8

    key = jax.random.PRNGKey(0)
    kp, k1, k2, k3 = jax.random.split(key, 4)
    params = init_params(kp, cfg)

    src_text_mask = jnp.ones((B, S_src), jnp.int32).at[0, -3:].set(0)
    src_text_tok = jax.random.randint(k1, (B, S_src), 1, cfg["vocab"]) * src_text_mask
    src_event_loc = jax.random.randint(k2, (B, E), 1, S_src - 4)
    src_event_pad_mask = jnp.ones((B, E), jnp.int32).at[1, -1:].set(0)
    tar_pad_mask = jnp.ones((B, S_tar), jnp.int32).at[0, -2:].set(0)
    tar_text_tok = jax.random.randint(k3, (B, S_tar), 1, cfg["vocab"]) * tar_pad_mask

    out = tree_bert2bert_forward(params, cfg, src_text_tok, src_text_mask,
                                 src_event_loc, src_event_pad_mask,
                                 tar_text_tok, tar_pad_mask, et_sep=True)
    jax.block_until_ready(out["loss"])
    jax.block_until_ready(out["logits"])
    assert out["logits"].shape == (B, S_tar, cfg["vocab"])
    print("KERNEL_OK")
</pallas_src>

<mosaic_0001>
module attributes {stable_mosaic.version = 11 : i64} {
  func.func @_ln_kernel(%arg0: i32, %arg1: memref<32x32xf32, #tpu.memory_space<vmem>>, %arg2: memref<1x32xf32, #tpu.memory_space<vmem>>, %arg3: memref<1x32xf32, #tpu.memory_space<vmem>>, %arg4: memref<32x32xbf16, #tpu.memory_space<vmem>>) attributes {dimension_semantics = [#tpu.dimension_semantics<parallel>], iteration_bounds = array<i64: 1>, scalar_prefetch = 0 : i64, scratch_operands = 0 : i64, tpu.core_type = #tpu.core_type<tc>, window_params = [{transform_indices = @transform_0, window_bounds = array<i64: 32, 32>}, {pipeline_mode = #tpu.pipeline_mode<synchronous>, transform_indices = @transform_1, window_bounds = array<i64: 1, 32>}, {pipeline_mode = #tpu.pipeline_mode<synchronous>, transform_indices = @transform_2, window_bounds = array<i64: 1, 32>}, {transform_indices = @transform_3, window_bounds = array<i64: 32, 32>}]} {
    %c0 = arith.constant 0 : index
    %c0_0 = arith.constant 0 : index
    %0 = vector.load %arg1[%c0, %c0_0] : memref<32x32xf32, #tpu.memory_space<vmem>>, vector<32x32xf32>
    %cst = arith.constant dense<0.000000e+00> : vector<32xf32>
    %1 = vector.multi_reduction <add>, %0, %cst [1] : vector<32x32xf32> to vector<32xf32>
    %2 = vector.shape_cast %1 : vector<32xf32> to vector<32x1xf32>
    %cst_1 = arith.constant 3.200000e+01 : f32
    %3 = vector.broadcast %cst_1 : f32 to vector<32x1xf32>
    %4 = arith.divf %2, %3 : vector<32x1xf32>
    %5 = vector.broadcast %4 : vector<32x1xf32> to vector<32x32xf32>
    %6 = arith.subf %0, %5 : vector<32x32xf32>
    %7 = arith.mulf %6, %6 : vector<32x32xf32>
    %cst_2 = arith.constant dense<0.000000e+00> : vector<32xf32>
    %8 = vector.multi_reduction <add>, %7, %cst_2 [1] : vector<32x32xf32> to vector<32xf32>
    %9 = vector.shape_cast %8 : vector<32xf32> to vector<32x1xf32>
    %cst_3 = arith.constant 3.200000e+01 : f32
    %10 = vector.broadcast %cst_3 : f32 to vector<32x1xf32>
    %11 = arith.divf %9, %10 : vector<32x1xf32>
    %12 = vector.broadcast %4 : vector<32x1xf32> to vector<32x32xf32>
    %13 = arith.subf %0, %12 : vector<32x32xf32>
    %cst_4 = arith.constant 9.99999996E-13 : f32
    %14 = vector.broadcast %cst_4 : f32 to vector<32x1xf32>
    %15 = arith.addf %11, %14 : vector<32x1xf32>
    %16 = math.rsqrt %15 : vector<32x1xf32>
    %17 = vector.broadcast %16 : vector<32x1xf32> to vector<32x32xf32>
    %18 = arith.mulf %13, %17 : vector<32x32xf32>
    %c0_5 = arith.constant 0 : index
    %c0_6 = arith.constant 0 : index
    %19 = vector.load %arg2[%c0_5, %c0_6] : memref<1x32xf32, #tpu.memory_space<vmem>>, vector<1x32xf32>
    %20 = vector.broadcast %19 : vector<1x32xf32> to vector<32x32xf32>
    %21 = arith.mulf %18, %20 : vector<32x32xf32>
    %c0_7 = arith.constant 0 : index
    %c0_8 = arith.constant 0 : index
    %22 = vector.load %arg3[%c0_7, %c0_8] : memref<1x32xf32, #tpu.memory_space<vmem>>, vector<1x32xf32>
    %23 = vector.broadcast %22 : vector<1x32xf32> to vector<32x32xf32>
    %24 = arith.addf %21, %23 : vector<32x32xf32>
    %25 = arith.truncf %24 : vector<32x32xf32> to vector<32x32xbf16>
    %c0_9 = arith.constant 0 : index
    %c0_10 = arith.constant 0 : index
    %26 = vector.load %arg4[%c0_9, %c0_10] : memref<32x32xbf16, #tpu.memory_space<vmem>>, vector<32x32xbf16>
    tpu.vector_store %arg4[%c0_9, %c0_10], %25 {strides = array<i32>} : memref<32x32xbf16, #tpu.memory_space<vmem>>, vector<32x32xbf16>,
    return
  }
  func.func @transform_0(%arg0: i32) -> (i32, i32) {
    %c0_i32 = arith.constant 0 : i32
    %c0_i32_0 = arith.constant 0 : i32
    return %arg0, %c0_i32 : i32, i32
  }
  func.func @transform_1(%arg0: i32) -> (i32, i32) {
    %c0_i32 = arith.constant 0 : i32
    %c0_i32_0 = arith.constant 0 : i32
    %c0_i32_1 = arith.constant 0 : i32
    return %c0_i32, %c0_i32_0 : i32, i32
  }
  func.func @transform_2(%arg0: i32) -> (i32, i32) {
    %c0_i32 = arith.constant 0 : i32
    %c0_i32_0 = arith.constant 0 : i32
    %c0_i32_1 = arith.constant 0 : i32
    return %c0_i32, %c0_i32_0 : i32, i32
  }
  func.func @transform_3(%arg0: i32) -> (i32, i32) {
    %c0_i32 = arith.constant 0 : i32
    %c0_i32_0 = arith.constant 0 : i32
    return %arg0, %c0_i32 : i32, i32
  }
}

</mosaic_0001>

<bundles_post_ra>
// kernel: tpu_custom_call.1
= control target key start
LH: loop header
LB: loop body
LE: loop exit
PB: predicated region body
PF: predicated region fallthrough
CT: control target
= control target key end

     0   :  { %8 = vsyncpa [#allocation3], 0  ;;  %s265_s0 = inlined_call_operand.hbm [shape: f32[32,32], index: 0, kind: input, shape index: {}]   ;;  %s266_s1 = inlined_call_operand.vmem [shape: f32[1,32], index: 1, kind: input, shape index: {}]   ;;  %s267_s2 = inlined_call_operand.vmem [shape: f32[1,32], index: 2, kind: input, shape index: {}]   ;;  %s268_s3 = inlined_call_operand.hbm [shape: bf16[32,32], index: 3, kind: output, shape index: {}]  }
   0x1   :  { %9 = vsyncpa [#allocation4], 0  ;;  %s215_s12 = smov [#allocation2]  }
   0x2   :  { %s15_s13 = sshll.u32 %s215_s12, 4  ;;  %s16_s13 = int_to_ptr.vmem [resolvable:$true] %s15_s13 }
   0x3   :  { %s179_s14 = scalar_lea.vmem %s16_s13, 512  ;;  %p184_p1 = scmp.lt.s32.totalorder %s16_s13, %s16_s13 }
   0x4   :  { %p180_p0 = scmp.ne.s32.totalorder %s16_s13, %s179_s14  ;;  %p185_p2 = scmp.lt.s32.totalorder %s179_s14, %s179_s14 }
   0x6   :  { %p186_p3 = por %p185_p2, %p184_p1 }
   0x8   :  { %p187_p4 = pnand %p186_p3, %p180_p0 }
   0xa   :  { %190 = shalt.err (!%p187_p4)
}
   0xb   :  { %s216_s15 = smov 128   ;;  %s217_s16 = smov 8  }
   0xc   :  { %21 = dma.hbm_to_vmem [thread:$0]  %s265_s0, 512, %s16_s13, [#allocation3], %s216_s15, %s216_s15, %s217_s16  }
   0xd   :  { %211 = dma.done.wait [#allocation3], 512  }
   0xe   :  { %212 = vsyncadd [#allocation3], 4294966784  ;;  %vm33_vm0 = vcmask 261120   ;;  %v29_v0 = vld [vmem:[#allocation2] sm:$0xff]  ;;  %v31_v1 = vld [vmem:[#allocation2 + $0x10] sm:$0xff]  ;;  %vm125_vm1 = vcmask 257024  }
   0xf   :  { %v30_v2 = vld [vmem:[#allocation2 + $0x8] sm:$0xff]  ;;  %v34_v3 = vsel %vm33_vm0, %v29_v0, 0.0  ;;  %v40_v4 = vsel %vm33_vm0, %v31_v1, 0.0  ;;  %v32_v5 = vld [vmem:[#allocation2 + $0x18] sm:$0xff]  ;;  %v147_v41 = vld [vmem:[%s266_s1] ss:$0 sm:$0xff] }
  0x10   :  { %35 = vadd.xlane.f32.xlu0 %v34_v3  ;;  %41 = vadd.xlane.f32.xlu1 %v40_v4  ;;  %v37_v6 = vsel %vm33_vm0, %v30_v2, 0.0  ;;  %v43_v7 = vsel %vm33_vm0, %v32_v5, 0.0  ;;  %v148_v43 = vld [vmem:[%s267_s2] ss:$0 sm:$0xff]  ;;  %s218_s1 = smov [#allocation5]  }
  0x11   :  { %s135_s2 = sshll.u32 %s218_s1, 4  ;;  %s136_s2 = int_to_ptr.vmem [resolvable:$true] %s135_s2 }
  0x12   :  { %s191_s22 = scalar_lea.vmem %s136_s2, 256  ;;  %p196_p6 = scmp.lt.s32.totalorder %s136_s2, %s136_s2 }
  0x13   :  { %p192_p5 = scmp.ne.s32.totalorder %s136_s2, %s191_s22  ;;  %p197_p7 = scmp.lt.s32.totalorder %s191_s22, %s191_s22 }
  0x14   :  { %38 = vadd.xlane.f32.xlu0 %v37_v6  ;;  %44 = vadd.xlane.f32.xlu1 %v43_v7 }
  0x15   :  { %p198_p8 = por %p197_p7, %p196_p6 }
  0x17   :  { %p199_p9 = pnand %p198_p8, %p192_p5 }
  0x99   :  { %v36_v8 = vpop.xlane.xlu0 %35  ;;  %v42_v9 = vpop.xlane.xlu1 %41 }
  0x9a   :  { %v47_v10 = vmul.f32 0.03125, %v36_v8  ;;  %v49_v11 = vmul.f32 0.03125, %v42_v9 }
  0x9c   :  { %v51_v12 = vsub.f32 %v29_v0, %v47_v10  ;;  %v53_v13 = vsub.f32 %v31_v1, %v49_v11 }
  0x9d   :  { %v39_v14 = vpop.xlane.xlu0 %38  ;;  %v45_v15 = vpop.xlane.xlu1 %44 }
  0x9e   :  { %v48_v16 = vmul.f32 0.03125, %v39_v14  ;;  %v50_v17 = vmul.f32 0.03125, %v45_v15  ;;  %v55_v18 = vmul.f32 %v51_v12, %v51_v12  ;;  %v57_v19 = vmul.f32 %v53_v13, %v53_v13 }
  0xa0   :  { %v52_v20 = vsub.f32 %v30_v2, %v48_v16  ;;  %v54_v21 = vsub.f32 %v32_v5, %v50_v17  ;;  %v59_v22 = vsel %vm33_vm0, %v55_v18, 0.0  ;;  %v65_v23 = vsel %vm33_vm0, %v57_v19, 0.0 }
  0xa1   :  { %60 = vadd.xlane.f32.xlu0 %v59_v22 }
  0xa2   :  { %v56_v24 = vmul.f32 %v52_v20, %v52_v20  ;;  %v58_v25 = vmul.f32 %v54_v21, %v54_v21 }
  0xa4   :  { %v62_v26 = vsel %vm33_vm0, %v56_v24, 0.0  ;;  %v68_v27 = vsel %vm33_vm0, %v58_v25, 0.0 }
  0xa5   :  { %66 = vadd.xlane.f32.xlu0 %v65_v23  ;;  %63 = vadd.xlane.f32.xlu1 %v62_v26 }
  0xa9   :  { %69 = vadd.xlane.f32.xlu1 %v68_v27 }
 0x12a   :  { %v61_v28 = vpop.xlane.xlu0 %60 }
 0x12b   :  { %v71_v29 = vmul.f32 0.03125, %v61_v28 }
 0x12d   :  { %v75_v30 = vadd.f32 1e-12, %v71_v29 }
 0x12e   :  { %v64_v31 = vpop.xlane.xlu1 %63  ;;  %v67_v32 = vpop.xlane.xlu0 %66 }
 0x12f   :  { %163 = vrsqrt.f32 %v75_v30  ;;  %v72_v33 = vmul.f32 0.03125, %v64_v31  ;;  %v73_v34 = vmul.f32 0.03125, %v67_v32 }
 0x131   :  { %v76_v35 = vadd.f32 1e-12, %v72_v33  ;;  %v77_v36 = vadd.f32 1e-12, %v73_v34 }
 0x132   :  { %v70_v37 = vpop.xlane.xlu1 %69 }
 0x133   :  { %165 = vrsqrt.f32 %v76_v35  ;;  %v74_v38 = vmul.f32 0.03125, %v70_v37 }
 0x134   :  { %167 = vrsqrt.f32 %v77_v36 }
 0x135   :  { %v78_v39 = vadd.f32 1e-12, %v74_v38 }
 0x137   :  { %169 = vrsqrt.f32 %v78_v39 }
 0x13c   :  { %v164_v40 = vpop.eup %163 }
 0x13d   :  { %v83_v42 = vmul.f32 %v164_v40, %v51_v12 }
 0x13f   :  { %v94_v44 = vmul.f32 %v147_v41, %v83_v42 }
 0x140   :  { %v166_v45 = vpop.eup %165 }
 0x141   :  { %v168_v46 = vpop.eup %167  ;;  %v105_v47 = vadd.f32 %v148_v43, %v94_v44  ;;  %v84_v48 = vmul.f32 %v166_v45, %v52_v20 }
 0x142   :  { %v85_v49 = vmul.f32 %v168_v46, %v53_v13 }
 0x143   :  { %v95_v50 = vmul.f32 %v147_v41, %v84_v48  ;;  %v153_v51 = vpack.c.bf16 %v105_v47, %v105_v47 }
 0x144   :  { %v170_v52 = vpop.eup %169  ;;  %v96_v53 = vmul.f32 %v147_v41, %v85_v49 }
 0x145   :  { %v106_v54 = vadd.f32 %v148_v43, %v95_v50  ;;  %v86_v55 = vmul.f32 %v170_v52, %v54_v21  ;;  %126 = vst.msk [vmem:[#allocation5] sm:$0xf] %vm125_vm1, %v153_v51 }
 0x146   :  { %v107_v56 = vadd.f32 %v148_v43, %v96_v53 }
 0x147   :  { %v97_v57 = vmul.f32 %v147_v41, %v86_v55  ;;  %v154_v58 = vpack.c.bf16 %v106_v54, %v106_v54 }
 0x148   :  { %v155_v59 = vpack.c.bf16 %v107_v56, %v107_v56 }
 0x149   :  { %v108_v60 = vadd.f32 %v148_v43, %v97_v57  ;;  %127 = vst.msk [vmem:[#allocation5 + $0x4] sm:$0xf] %vm125_vm1, %v154_v58 }
 0x14a   :  { %128 = vst.msk [vmem:[#allocation5 + $0x8] sm:$0xf] %vm125_vm1, %v155_v59 }
 0x14b   :  { %v156_v61 = vpack.c.bf16 %v108_v60, %v108_v60 }
 0x14d   :  { %129 = vst.msk [vmem:[#allocation5 + $0xc] sm:$0xf] %vm125_vm1, %v156_v61 }
 0x14e   :  { %202 = shalt.err (!%p199_p9)
}
 0x14f   :  { %s219_s23 = smov 64   ;;  %s220_s24 = smov 4  }
 0x150   :  { %141 = dma.vmem_to_hbm [thread:$0]  %s136_s2, 256, %s268_s3, [#allocation4], %s219_s23, %s219_s23, %s220_s24  }
 0x151   :  { %213 = dma.done.wait [#allocation4], 256  }
 0x152   :  { %214 = vsyncadd [#allocation4], 4294967040 }
 0x153   :  { %145 = vsyncpa [#allocation3], 1 }
 0x154   :  { %146 = vsyncpa [#allocation4], 1 }

</bundles_post_ra>
